<compile_context>
chip_gen: v6e
topology: v6e:2x2x1
jax: 0.10.0
libtpu: 0.0.40
codegen_flags: <defaults>
</compile_context>

<pallas_src>
import functools

import jax
import jax.numpy as jnp
from jax.experimental import pallas as pl
from jax.experimental.pallas import tpu as pltpu


_TM = 512                     # max rows per M tile
_TM_MIN_SPLIT = 256           # split M into >=2 tiles (v7x megacore) once mp >= 2x this
_TN = 512                     # max output-channel tile (keeps W tiles small in VMEM)
_VMEM_LIMIT = 32 * 1024 * 1024
_LRELU_SLOPE = 0.2
_BN_EPS = 1e-5


# ----------------------------- Pallas kernels ------------------------------ #

def _matmul_lrelu_kernel(x_ref, w_ref, o_ref):
    """Conv tile (patches @ W, bf16 in / f32 acc) + LeakyReLU(0.2) -> bf16."""
    y = jnp.dot(x_ref[...], w_ref[...], preferred_element_type=jnp.float32)
    o_ref[...] = jnp.maximum(y, _LRELU_SLOPE * y).astype(o_ref.dtype)


def _matmul_sigmoid_kernel(x_ref, w_ref, o_ref):
    """Final conv tile + exact Sigmoid (torch.sigmoid parity) -> f32."""
    y = jnp.dot(x_ref[...], w_ref[...], preferred_element_type=jnp.float32)
    o_ref[...] = (1.0 / (1.0 + jnp.exp(-y))).astype(o_ref.dtype)


def _fused_conv_bn_lrelu_kernel(x_ref, w_ref, g_ref, b_ref, o_ref, *, m_rows):
    """Conv + training-mode BatchNorm2d + LeakyReLU(0.2), fused (single M tile).

    Zero-padded rows contribute 0 to the channel sums; the (row < m_rows) mask
    excludes them from the mean-subtracted variance, so stats match the true
    batch statistics exactly.
    """
    y = jnp.dot(x_ref[...], w_ref[...], preferred_element_type=jnp.float32)
    inv_m = 1.0 / m_rows
    mean = jnp.sum(y, axis=0, keepdims=True) * inv_m                  # (1, tn)
    row = jax.lax.broadcasted_iota(jnp.int32, y.shape, 0)
    d = jnp.where(row < m_rows, y - mean, 0.0)                        # mask pad rows
    var = jnp.sum(d * d, axis=0, keepdims=True) * inv_m               # biased var
    scale = g_ref[...] * jax.lax.rsqrt(var + _BN_EPS)
    shift = b_ref[...] - mean * scale
    z = y * scale + shift
    o_ref[...] = jnp.maximum(z, _LRELU_SLOPE * z).astype(o_ref.dtype)


def _matmul_stats_kernel(x_ref, w_ref, y_ref, stats_ref):
    """Fallback (multi-tile M) phase 1: conv tile + per-tile BN partial sums."""
    y = jnp.dot(x_ref[...], w_ref[...], preferred_element_type=jnp.float32)
    y_ref[...] = y
    stats_ref[0, 0:1, :] = jnp.sum(y, axis=0, keepdims=True)
    stats_ref[0, 1:2, :] = jnp.sum(y * y, axis=0, keepdims=True)


def _scale_shift_lrelu_kernel(y_ref, scale_ref, shift_ref, o_ref):
    """Fallback phase 2: BatchNorm apply + LeakyReLU(0.2) -> bf16."""
    z = y_ref[...] * scale_ref[...] + shift_ref[...]
    o_ref[...] = jnp.maximum(z, _LRELU_SLOPE * z).astype(o_ref.dtype)


# ------------------------------- JAX glue ---------------------------------- #

def _round_up(x, m):
    return ((x + m - 1) // m) * m


def _n_tiling(n):
    """Pad OC to 128 (small) / 256 (large, wide-MXU aligned); tile at <=512."""
    np_ = _round_up(n, 128) if n <= 128 else _round_up(n, 256)
    if np_ <= _TN:
        tn = np_
    else:
        tn = 256
        np_ = _round_up(np_, tn)
    return np_, tn, np_ // tn


def _m_tiling(m, prefer_split):
    """Rows padded to x16 (bf16 packing); split into >=2 tiles when big enough."""
    mp0 = _round_up(m, 16)
    if mp0 <= _TM and not (prefer_split and mp0 >= 2 * _TM_MIN_SPLIT):
        return mp0, mp0, 1
    ntiles = max(2 if prefer_split else 1, -(-mp0 // _TM))
    tm = _round_up(-(-mp0 // ntiles), 16)
    mp = _round_up(mp0, tm)
    return mp, tm, mp // tm


def _pad_operands(patches, w, prefer_split):
    m, k = patches.shape
    _, n = w.shape
    kp = _round_up(k, 16)                       # no 128-pad on K (full-dim blocks)
    np_, tn, gn = _n_tiling(n)
    mp, tm, gm = _m_tiling(m, prefer_split)
    xp = jnp.pad(patches, ((0, mp - m), (0, kp - k))).astype(jnp.bfloat16)
    wp = jnp.pad(w, ((0, kp - k), (0, np_ - n))).astype(jnp.bfloat16)
    return xp, wp, m, n, kp, np_, mp, tm, gm, tn, gn


def _conv_act(patches, w, act):
    """Tiled conv-as-matmul + activation ('lrelu' -> bf16, 'sigmoid' -> f32)."""
    xp, wp, m, n, kp, np_, mp, tm, gm, tn, gn = _pad_operands(
        patches, w, prefer_split=True)
    if act == "lrelu":
        kernel, out_dtype, transcend = _matmul_lrelu_kernel, jnp.bfloat16, 0
    else:
        kernel, out_dtype, transcend = _matmul_sigmoid_kernel, jnp.float32, mp * np_
    out_bytes = mp * np_ * jnp.dtype(out_dtype).itemsize
    out = pl.pallas_call(
        kernel,
        grid=(gm, gn),
        in_specs=[pl.BlockSpec((tm, kp), lambda i, j: (i, 0)),
                  pl.BlockSpec((kp, tn), lambda i, j: (0, j))],
        out_specs=pl.BlockSpec((tm, tn), lambda i, j: (i, j)),
        out_shape=jax.ShapeDtypeStruct((mp, np_), out_dtype),
        compiler_params=pltpu.CompilerParams(
            dimension_semantics=("parallel", "parallel"),
            vmem_limit_bytes=_VMEM_LIMIT),
        cost_estimate=pl.CostEstimate(
            flops=2 * mp * kp * np_,
            transcendentals=transcend,
            bytes_accessed=xp.size * 2 * gn + wp.size * 2 * gm + out_bytes),
    )(xp, wp)
    return out[:m, :n]


def _conv_bn_lrelu(patches, w, gamma, beta):
    """Conv + training-mode BatchNorm2d + LeakyReLU(0.2); fused when gm == 1."""
    # Fusion needs all rows in one M tile so channel stats exist in-kernel.
    xp, wp, m, n, kp, np_, mp, tm, gm, tn, gn = _pad_operands(
        patches, w, prefer_split=False)
    gp = jnp.pad(gamma, ((0, 0), (0, np_ - n))).astype(jnp.float32)
    bp = jnp.pad(beta, ((0, 0), (0, np_ - n))).astype(jnp.float32)

    if gm == 1:
        kernel = functools.partial(_fused_conv_bn_lrelu_kernel, m_rows=m)
        out = pl.pallas_call(
            kernel,
            grid=(gn,),
            in_specs=[pl.BlockSpec((tm, kp), lambda j: (0, 0)),
                      pl.BlockSpec((kp, tn), lambda j: (0, j)),
                      pl.BlockSpec((1, tn), lambda j: (0, j)),
                      pl.BlockSpec((1, tn), lambda j: (0, j))],
            out_specs=pl.BlockSpec((tm, tn), lambda j: (0, j)),
            out_shape=jax.ShapeDtypeStruct((mp, np_), jnp.bfloat16),
            compiler_params=pltpu.CompilerParams(
                dimension_semantics=("parallel",),
                vmem_limit_bytes=_VMEM_LIMIT),
            cost_estimate=pl.CostEstimate(
                flops=2 * mp * kp * np_ + 8 * mp * np_,
                transcendentals=np_,
                bytes_accessed=xp.size * 2 + wp.size * 2
                               + mp * np_ * 2 + 4 * np_ * 4),
        )(xp, wp, gp, bp)
        return out[:m, :n]

    # Fallback for large M: tiled matmul + partial stats, finalize, then apply.
    y, stats = pl.pallas_call(
        _matmul_stats_kernel,
        grid=(gm, gn),
        in_specs=[pl.BlockSpec((tm, kp), lambda i, j: (i, 0)),
                  pl.BlockSpec((kp, tn), lambda i, j: (0, j))],
        out_specs=[pl.BlockSpec((tm, tn), lambda i, j: (i, j)),
                   pl.BlockSpec((1, 2, tn), lambda i, j: (i, 0, j))],
        out_shape=[jax.ShapeDtypeStruct((mp, np_), jnp.float32),
                   jax.ShapeDtypeStruct((gm, 2, np_), jnp.float32)],
        compiler_params=pltpu.CompilerParams(
            dimension_semantics=("parallel", "parallel"),
            vmem_limit_bytes=_VMEM_LIMIT),
        cost_estimate=pl.CostEstimate(
            flops=2 * mp * kp * np_,
            transcendentals=0,
            bytes_accessed=xp.size * 2 * gn + wp.size * 2 * gm
                           + mp * np_ * 4 + gm * 2 * np_ * 4),
    )(xp, wp)

    s = jnp.sum(stats, axis=0)                                   # (2, Np)
    mean = s[0] / m
    var = jnp.maximum(s[1] / m - mean * mean, 0.0)
    scale = gp * jax.lax.rsqrt(var + _BN_EPS)[None, :]           # (1, Np)
    shift = bp - mean[None, :] * scale

    out = pl.pallas_call(
        _scale_shift_lrelu_kernel,
        grid=(gm, gn),
        in_specs=[pl.BlockSpec((tm, tn), lambda i, j: (i, j)),
                  pl.BlockSpec((1, tn), lambda i, j: (0, j)),
                  pl.BlockSpec((1, tn), lambda i, j: (0, j))],
        out_specs=pl.BlockSpec((tm, tn), lambda i, j: (i, j)),
        out_shape=jax.ShapeDtypeStruct((mp, np_), jnp.bfloat16),
        compiler_params=pltpu.CompilerParams(
            dimension_semantics=("parallel", "parallel"),
            vmem_limit_bytes=_VMEM_LIMIT),
        cost_estimate=pl.CostEstimate(
            flops=3 * mp * np_,
            transcendentals=0,
            bytes_accessed=mp * np_ * 4 + mp * np_ * 2 + 2 * np_ * 4),
    )(y, scale, shift)
    return out[:m, :n]


def im2col_nhwc(x, kh, kw, stride, pad):
    """NHWC x -> patches (B*OH*OW, KH*KW*C) with channel-fast columns."""
    b, h, w, c = x.shape
    xp = jnp.pad(x, ((0, 0), (pad, pad), (pad, pad), (0, 0)))
    oh = (h + 2 * pad - kh) // stride + 1
    ow = (w + 2 * pad - kw) // stride + 1
    cols = []
    for i in range(kh):
        for j in range(kw):
            cols.append(xp[:, i:i + stride * (oh - 1) + 1:stride,
                            j:j + stride * (ow - 1) + 1:stride, :])
    p = jnp.concatenate(cols, axis=-1)                 # (B, OH, OW, KH*KW*C)
    return p.reshape(b * oh * ow, kh * kw * c), oh, ow


# --------------------------- parameters / model ----------------------------- #

def _to_matmul_weight(w_oihw):
    """PyTorch conv weight (OC, IC, KH, KW) -> (KH*KW*IC, OC), channel-fast rows."""
    oc, ic, kh, kw = w_oihw.shape
    return w_oihw.transpose(2, 3, 1, 0).reshape(kh * kw * ic, oc)


def init_params(key, input_size, num_input_channels, n_features):
    """Deterministic synthetic parameters mirroring Discriminator.__init__ shapes."""
    params = {}
    k, key = jax.random.split(key)
    w = 0.05 * jax.random.normal(k, (n_features, num_input_channels, 4, 4), jnp.float32)
    params["initial"] = _to_matmul_weight(w)

    pyramid = []
    nf = n_features
    pdim = min(input_size) // 2
    while pdim > 4:
        k1, k2, k3, key = jax.random.split(key, 4)
        w = 0.05 * jax.random.normal(k1, (2 * nf, nf, 4, 4), jnp.float32)
        gamma = 1.0 + 0.1 * jax.random.normal(k2, (1, 2 * nf), jnp.float32)
        beta = 0.1 * jax.random.normal(k3, (1, 2 * nf), jnp.float32)
        pyramid.append({"w": _to_matmul_weight(w), "gamma": gamma, "beta": beta})
        nf *= 2
        pdim //= 2
    params["pyramid"] = pyramid

    k, key = jax.random.split(key)
    w = 0.05 * jax.random.normal(k, (1, nf, 4, 4), jnp.float32)   # latent_vec_size=1
    params["final"] = _to_matmul_weight(w)
    return params


def discriminator_forward(x, params):
    """Returns (classifier, features) exactly like Discriminator.forward."""
    b = x.shape[0]
    h = x.transpose(0, 2, 3, 1)                         # NCHW -> NHWC (once)

    # features: initial conv (k4, s2, p4, no bias) + LeakyReLU(0.2)  [bf16 out]
    p, oh, ow = im2col_nhwc(h, 4, 4, 2, 4)
    y = _conv_act(p, params["initial"], act="lrelu")
    h = y.reshape(b, oh, ow, -1)

    # features: pyramid blocks conv(k4,s2,p1) + BatchNorm2d (train stats) + LeakyReLU
    for blk in params["pyramid"]:
        p, oh, ow = im2col_nhwc(h, 4, 4, 2, 1)
        y = _conv_bn_lrelu(p, blk["w"], blk["gamma"], blk["beta"])
        h = y.reshape(b, oh, ow, -1)

    features = h.astype(jnp.float32).transpose(0, 3, 1, 2)   # NHWC -> NCHW (API)

    # classifier: final conv (k4, s1, p0, no bias) + Sigmoid
    p, oh, ow = im2col_nhwc(h, 4, 4, 1, 0)
    y = _conv_act(p, params["final"], act="sigmoid")    # (B*oh*ow, 1) f32
    classifier = y.reshape(-1)                          # == .view(-1,1).squeeze(1)
    return classifier, features


# ---------------------------------- main ------------------------------------ #

if __name__ == "__main__":
    key = jax.random.PRNGKey(0)
    kx, kp = jax.random.split(key)

    B, C, H, W = 2, 3, 16, 16          # input_size=(16,16), n_features=8
    n_features = 8
    x = jax.random.normal(kx, (B, C, H, W), jnp.float32)
    params = init_params(kp, (H, W), C, n_features)

    classifier, features = jax.jit(discriminator_forward)(x, params)
    jax.block_until_ready((classifier, features))

    # Shapes implied by the module at this config:
    #   initial conv: 16x16 -> 11x11 ; pyramid: 11x11 -> 5x5 (ch 8->16) ; final: 5x5 -> 2x2
    assert features.shape == (B, 2 * n_features, 5, 5), features.shape
    assert classifier.shape == (B * 2 * 2,), classifier.shape
    # exact sigmoid -> strictly within [0, 1]
    assert bool(jnp.all((classifier >= 0.0) & (classifier <= 1.0)))
    assert bool(jnp.all(jnp.isfinite(features)))

    print("KERNEL_OK")
</pallas_src>

<mosaic_0001>
module attributes {stable_mosaic.version = 11 : i64} {
  func.func @_matmul_lrelu_kernel(%arg0: i32, %arg1: i32, %arg2: memref<256x48xbf16, #tpu.memory_space<vmem>>, %arg3: memref<48x128xbf16, #tpu.memory_space<vmem>>, %arg4: memref<256x128xbf16, #tpu.memory_space<vmem>>) attributes {dimension_semantics = [#tpu.dimension_semantics<parallel>, #tpu.dimension_semantics<parallel>], iteration_bounds = array<i64: 1, 1>, scalar_prefetch = 0 : i64, scratch_operands = 0 : i64, tpu.core_type = #tpu.core_type<tc>, window_params = [{transform_indices = @transform_0, window_bounds = array<i64: 256, 48>}, {transform_indices = @transform_1, window_bounds = array<i64: 48, 128>}, {transform_indices = @transform_2, window_bounds = array<i64: 256, 128>}]} {
    %c0 = arith.constant 0 : index
    %c0_0 = arith.constant 0 : index
    %0 = vector.load %arg2[%c0, %c0_0] : memref<256x48xbf16, #tpu.memory_space<vmem>>, vector<256x48xbf16>
    %c0_1 = arith.constant 0 : index
    %c0_2 = arith.constant 0 : index
    %1 = vector.load %arg3[%c0_1, %c0_2] : memref<48x128xbf16, #tpu.memory_space<vmem>>, vector<48x128xbf16>
    %cst = arith.constant dense<0.000000e+00> : vector<256x128xf32>
    %2 = tpu.matmul %0, %1, %cst {dimension_numbers = #tpu.dot_dimension_numbers<[1], [0], [0], [1], [0, 0, 1, 1], [], []>} : vector<256x48xbf16>, vector<48x128xbf16>, vector<256x128xf32> -> vector<256x128xf32>
    %cst_3 = arith.constant 2.000000e-01 : f32
    %3 = vector.broadcast %cst_3 : f32 to vector<256x128xf32>
    %4 = arith.mulf %3, %2 : vector<256x128xf32>
    %5 = arith.maximumf %2, %4 : vector<256x128xf32>
    %6 = arith.truncf %5 : vector<256x128xf32> to vector<256x128xbf16>
    %c0_4 = arith.constant 0 : index
    %c0_5 = arith.constant 0 : index
    %7 = vector.load %arg4[%c0_4, %c0_5] : memref<256x128xbf16, #tpu.memory_space<vmem>>, vector<256x128xbf16>
    tpu.vector_store %arg4[%c0_4, %c0_5], %6 {strides = array<i32>} : memref<256x128xbf16, #tpu.memory_space<vmem>>, vector<256x128xbf16>,
    return
  }
  func.func @transform_0(%arg0: i32, %arg1: i32) -> (i32, i32) {
    %c0_i32 = arith.constant 0 : i32
    %c0_i32_0 = arith.constant 0 : i32
    return %arg0, %c0_i32 : i32, i32
  }
  func.func @transform_1(%arg0: i32, %arg1: i32) -> (i32, i32) {
    %c0_i32 = arith.constant 0 : i32
    %c0_i32_0 = arith.constant 0 : i32
    return %c0_i32, %arg1 : i32, i32
  }
  func.func @transform_2(%arg0: i32, %arg1: i32) -> (i32, i32) {
    %c0_i32 = arith.constant 0 : i32
    return %arg0, %arg1 : i32, i32
  }
}

module attributes {stable_mosaic.version = 11 : i64} {
  func.func @_fused_conv_bn_lrelu_kernel(%arg0: i32, %arg1: memref<64x128xbf16, #tpu.memory_space<vmem>>, %arg2: memref<128x128xbf16, #tpu.memory_space<vmem>>, %arg3: memref<1x128xf32, #tpu.memory_space<vmem>>, %arg4: memref<1x128xf32, #tpu.memory_space<vmem>>, %arg5: memref<64x128xbf16, #tpu.memory_space<vmem>>) attributes {dimension_semantics = [#tpu.dimension_semantics<parallel>], iteration_bounds = array<i64: 1>, scalar_prefetch = 0 : i64, scratch_operands = 0 : i64, tpu.core_type = #tpu.core_type<tc>, window_params = [{pipeline_mode = #tpu.pipeline_mode<synchronous>, transform_indices = @transform_0, window_bounds = array<i64: 64, 128>}, {transform_indices = @transform_1, window_bounds = array<i64: 128, 128>}, {transform_indices = @transform_2, window_bounds = array<i64: 1, 128>}, {transform_indices = @transform_3, window_bounds = array<i64: 1, 128>}, {transform_indices = @transform_4, window_bounds = array<i64: 64, 128>}]} {
    %c0 = arith.constant 0 : index
    %c0_0 = arith.constant 0 : index
    %0 = vector.load %arg1[%c0, %c0_0] : memref<64x128xbf16, #tpu.memory_space<vmem>>, vector<64x128xbf16>
    %c0_1 = arith.constant 0 : index
    %c0_2 = arith.constant 0 : index
    %1 = vector.load %arg2[%c0_1, %c0_2] : memref<128x128xbf16, #tpu.memory_space<vmem>>, vector<128x128xbf16>
    %cst = arith.constant dense<0.000000e+00> : vector<64x128xf32>
    %2 = tpu.matmul %0, %1, %cst {dimension_numbers = #tpu.dot_dimension_numbers<[1], [0], [0], [1], [0, 0, 1, 1], [], []>} : vector<64x128xbf16>, vector<128x128xbf16>, vector<64x128xf32> -> vector<64x128xf32>
    %cst_3 = arith.constant dense<0.000000e+00> : vector<128xf32>
    %3 = vector.multi_reduction <add>, %2, %cst_3 [0] : vector<64x128xf32> to vector<128xf32>
    %4 = vector.shape_cast %3 : vector<128xf32> to vector<1x128xf32>
    %cst_4 = arith.constant 2.000000e-02 : f32
    %5 = vector.broadcast %cst_4 : f32 to vector<1x128xf32>
    %6 = arith.mulf %4, %5 : vector<1x128xf32>
    %7 = tpu.iota {dimensions = array<i32: 0>} : vector<64x128xi32>
    %c50_i32 = arith.constant 50 : i32
    %8 = vector.broadcast %c50_i32 : i32 to vector<64x128xi32>
    %9 = arith.cmpi slt, %7, %8 : vector<64x128xi32>
    %10 = vector.broadcast %6 : vector<1x128xf32> to vector<64x128xf32>
    %11 = arith.subf %2, %10 : vector<64x128xf32>
    %cst_5 = arith.constant 0.000000e+00 : f32
    %12 = vector.broadcast %cst_5 : f32 to vector<64x128xf32>
    %13 = arith.select %9, %11, %12 : vector<64x128xi1>, vector<64x128xf32>
    %14 = arith.mulf %13, %13 : vector<64x128xf32>
    %cst_6 = arith.constant dense<0.000000e+00> : vector<128xf32>
    %15 = vector.multi_reduction <add>, %14, %cst_6 [0] : vector<64x128xf32> to vector<128xf32>
    %16 = vector.shape_cast %15 : vector<128xf32> to vector<1x128xf32>
    %cst_7 = arith.constant 2.000000e-02 : f32
    %17 = vector.broadcast %cst_7 : f32 to vector<1x128xf32>
    %18 = arith.mulf %16, %17 : vector<1x128xf32>
    %c0_8 = arith.constant 0 : index
    %c0_9 = arith.constant 0 : index
    %19 = vector.load %arg3[%c0_8, %c0_9] : memref<1x128xf32, #tpu.memory_space<vmem>>, vector<1x128xf32>
    %cst_10 = arith.constant 9.99999974E-6 : f32
    %20 = vector.broadcast %cst_10 : f32 to vector<1x128xf32>
    %21 = arith.addf %18, %20 : vector<1x128xf32>
    %22 = math.rsqrt %21 : vector<1x128xf32>
    %23 = arith.mulf %19, %22 : vector<1x128xf32>
    %c0_11 = arith.constant 0 : index
    %c0_12 = arith.constant 0 : index
    %24 = vector.load %arg4[%c0_11, %c0_12] : memref<1x128xf32, #tpu.memory_space<vmem>>, vector<1x128xf32>
    %25 = arith.mulf %6, %23 : vector<1x128xf32>
    %26 = arith.subf %24, %25 : vector<1x128xf32>
    %27 = vector.broadcast %23 : vector<1x128xf32> to vector<64x128xf32>
    %28 = arith.mulf %2, %27 : vector<64x128xf32>
    %29 = vector.broadcast %26 : vector<1x128xf32> to vector<64x128xf32>
    %30 = arith.addf %28, %29 : vector<64x128xf32>
    %cst_13 = arith.constant 2.000000e-01 : f32
    %31 = vector.broadcast %cst_13 : f32 to vector<64x128xf32>
    %32 = arith.mulf %31, %30 : vector<64x128xf32>
    %33 = arith.maximumf %30, %32 : vector<64x128xf32>
    %34 = arith.truncf %33 : vector<64x128xf32> to vector<64x128xbf16>
    %c0_14 = arith.constant 0 : index
    %c0_15 = arith.constant 0 : index
    %35 = vector.load %arg5[%c0_14, %c0_15] : memref<64x128xbf16, #tpu.memory_space<vmem>>, vector<64x128xbf16>
    tpu.vector_store %arg5[%c0_14, %c0_15], %34 {strides = array<i32>} : memref<64x128xbf16, #tpu.memory_space<vmem>>, vector<64x128xbf16>,
    return
  }
  func.func @transform_0(%arg0: i32) -> (i32, i32) {
    %c0_i32 = arith.constant 0 : i32
    %c0_i32_0 = arith.constant 0 : i32
    %c0_i32_1 = arith.constant 0 : i32
    return %c0_i32, %c0_i32_0 : i32, i32
  }
  func.func @transform_1(%arg0: i32) -> (i32, i32) {
    %c0_i32 = arith.constant 0 : i32
    %c0_i32_0 = arith.constant 0 : i32
    return %c0_i32, %arg0 : i32, i32
  }
  func.func @transform_2(%arg0: i32) -> (i32, i32) {
    %c0_i32 = arith.constant 0 : i32
    %c0_i32_0 = arith.constant 0 : i32
    return %c0_i32, %arg0 : i32, i32
  }
  func.func @transform_3(%arg0: i32) -> (i32, i32) {
    %c0_i32 = arith.constant 0 : i32
    %c0_i32_0 = arith.constant 0 : i32
    return %c0_i32, %arg0 : i32, i32
  }
  func.func @transform_4(%arg0: i32) -> (i32, i32) {
    %c0_i32 = arith.constant 0 : i32
    %c0_i32_0 = arith.constant 0 : i32
    return %c0_i32, %arg0 : i32, i32
  }
}

module attributes {stable_mosaic.version = 11 : i64} {
  func.func @_matmul_sigmoid_kernel(%arg0: i32, %arg1: i32, %arg2: memref<16x256xbf16, #tpu.memory_space<vmem>>, %arg3: memref<256x128xbf16, #tpu.memory_space<vmem>>, %arg4: memref<16x128xf32, #tpu.memory_space<vmem>>) attributes {dimension_semantics = [#tpu.dimension_semantics<parallel>, #tpu.dimension_semantics<parallel>], iteration_bounds = array<i64: 1, 1>, scalar_prefetch = 0 : i64, scratch_operands = 0 : i64, tpu.core_type = #tpu.core_type<tc>, window_params = [{transform_indices = @transform_0, window_bounds = array<i64: 16, 256>}, {transform_indices = @transform_1, window_bounds = array<i64: 256, 128>}, {transform_indices = @transform_2, window_bounds = array<i64: 16, 128>}]} {
    %c0 = arith.constant 0 : index
    %c0_0 = arith.constant 0 : index
    %0 = vector.load %arg2[%c0, %c0_0] : memref<16x256xbf16, #tpu.memory_space<vmem>>, vector<16x256xbf16>
    %c0_1 = arith.constant 0 : index
    %c0_2 = arith.constant 0 : index
    %1 = vector.load %arg3[%c0_1, %c0_2] : memref<256x128xbf16, #tpu.memory_space<vmem>>, vector<256x128xbf16>
    %cst = arith.constant dense<0.000000e+00> : vector<16x128xf32>
    %2 = tpu.matmul %0, %1, %cst {dimension_numbers = #tpu.dot_dimension_numbers<[1], [0], [0], [1], [0, 0, 1, 1], [], []>} : vector<16x256xbf16>, vector<256x128xbf16>, vector<16x128xf32> -> vector<16x128xf32>
    %cst_3 = arith.constant 0.000000e+00 : f32
    %3 = vector.broadcast %cst_3 : f32 to vector<16x128xf32>
    %4 = arith.subf %3, %2 : vector<16x128xf32>
    %5 = math.exp %4 : vector<16x128xf32>
    %cst_4 = arith.constant 1.000000e+00 : f32
    %6 = vector.broadcast %cst_4 : f32 to vector<16x128xf32>
    %7 = arith.addf %6, %5 : vector<16x128xf32>
    %cst_5 = arith.constant 1.000000e+00 : f32
    %8 = vector.broadcast %cst_5 : f32 to vector<16x128xf32>
    %9 = arith.divf %8, %7 : vector<16x128xf32>
    %c0_6 = arith.constant 0 : index
    %c0_7 = arith.constant 0 : index
    %10 = vector.load %arg4[%c0_6, %c0_7] : memref<16x128xf32, #tpu.memory_space<vmem>>, vector<16x128xf32>
    tpu.vector_store %arg4[%c0_6, %c0_7], %9 {strides = array<i32>} : memref<16x128xf32, #tpu.memory_space<vmem>>, vector<16x128xf32>,
    return
  }
  func.func @transform_0(%arg0: i32, %arg1: i32) -> (i32, i32) {
    %c0_i32 = arith.constant 0 : i32
    %c0_i32_0 = arith.constant 0 : i32
    return %arg0, %c0_i32 : i32, i32
  }
  func.func @transform_1(%arg0: i32, %arg1: i32) -> (i32, i32) {
    %c0_i32 = arith.constant 0 : i32
    %c0_i32_0 = arith.constant 0 : i32
    return %c0_i32, %arg1 : i32, i32
  }
  func.func @transform_2(%arg0: i32, %arg1: i32) -> (i32, i32) {
    %c0_i32 = arith.constant 0 : i32
    return %arg0, %arg1 : i32, i32
  }
}

</mosaic_0001>

<bundles_post_ra>
// kernel: discriminator_forward.3
= control target key start
LH: loop header
LB: loop body
LE: loop exit
PB: predicated region body
PF: predicated region fallthrough
CT: control target
= control target key end

     0   :  { %vm148_vm0 = vcmask 392192   ;;  %s998_s1 = inlined_call_operand.vmem [shape: bf16[48,128], index: 1, kind: input, shape index: {}]   ;;  %s999_s0 = inlined_call_operand.vmem [shape: bf16[256,48], index: 0, kind: input, shape index: {}]   ;;  %s1000_s2 = inlined_call_operand.vmem [shape: bf16[256,128], index: 2, kind: output, shape index: {}]  }
   0x1   :  { %v843_v0 = vld [vmem:[%s998_s1 + $0x10] sm:$0xff]   ;;  %v844_v1 = vld [vmem:[%s998_s1 + $0x8] sm:$0xff]   ;;  %v845_v2 = vld [vmem:[%s998_s1] sm:$0xff]  }
   0x2   :  { %799 = vmatprep.subr.bf16.mxu0 %v843_v0  ;;  %837 = vmatprep.subr.bf16.mxu1 %v843_v0  ;;  %v846_v3 = vld [vmem:[%s999_s0] sm:$0xff]   ;;  %v848_v5 = vld [vmem:[%s999_s0 + $0x8] sm:$0xff]   ;;  %v850_v7 = vld [vmem:[%s999_s0 + $0x10] sm:$0xff]  }
   0x3   :  { %800 = vmatpush3.bf16.msra.mxu0 %v843_v0  ;;  %840 = vmatpush3.bf16.msra.mxu1 %v843_v0  ;;  %v847_v4 = vld [vmem:[%s999_s0 + $0x40] sm:$0xff]   ;;  %v849_v6 = vld [vmem:[%s999_s0 + $0x48] sm:$0xff]   ;;  %v851_v8 = vld [vmem:[%s999_s0 + $0x50] sm:$0xff]  }
   0x4   :  { %801 = vmatprep.subr.bf16.mxu0 %v844_v1  ;;  %838 = vmatprep.subr.bf16.mxu1 %v844_v1  ;;  %v852_v9 = vld [vmem:[%s999_s0 + $0x18] sm:$0xff]   ;;  %v854_v11 = vld [vmem:[%s999_s0 + $0x20] sm:$0xff]   ;;  %v856_v13 = vld [vmem:[%s999_s0 + $0x28] sm:$0xff]  }
   0x5   :  { %805 = vmatprep.mubr.msk.bf16.mxu0 %vm148_vm0, %v846_v3  ;;  %821 = vmatprep.mubr.msk.bf16.mxu1 %vm148_vm0, %v847_v4  ;;  %v853_v10 = vld [vmem:[%s999_s0 + $0x58] sm:$0xff]   ;;  %v855_v12 = vld [vmem:[%s999_s0 + $0x60] sm:$0xff]   ;;  %v857_v14 = vld [vmem:[%s999_s0 + $0x68] sm:$0xff]  }
   0x6   :  { %v858_v15 = vld [vmem:[%s999_s0 + $0x30] sm:$0xff]   ;;  %v860_v17 = vld [vmem:[%s999_s0 + $0x38] sm:$0xff]  }
   0x7   :  { %802 = vmatpush3.bf16.msra.mxu0 %v844_v1  ;;  %841 = vmatpush3.bf16.msra.mxu1 %v844_v1  ;;  %v859_v16 = vld [vmem:[%s999_s0 + $0x70] sm:$0xff]   ;;  %v861_v18 = vld [vmem:[%s999_s0 + $0x78] sm:$0xff]  }
   0x8   :  { %803 = vmatprep.subr.bf16.mxu0 %v845_v2  ;;  %839 = vmatprep.subr.bf16.mxu1 %v845_v2 }
   0xb   :  { %804 = vmatpush3.bf16.msra.mxu0 %v845_v2  ;;  %842 = vmatpush3.bf16.msra.mxu1 %v845_v2 }
   0xe   :  { %806 = vmatmul.mubr.msk.bf16.vlgmr.msra.gmra.mxu0 %vm148_vm0, %v848_v5  ;;  %822 = vmatmul.mubr.msk.bf16.vlgmr.msra.gmra.mxu1 %vm148_vm0, %v849_v6 }
   0xf   :  { %809 = vmatprep.mubr.msk.bf16.mxu0 %vm148_vm0, %v850_v7  ;;  %825 = vmatprep.mubr.msk.bf16.mxu1 %vm148_vm0, %v851_v8 }
  0x16   :  { %810 = vmatmul.mubr.msk.bf16.gmra.mxu0 %vm148_vm0, %v852_v9  ;;  %826 = vmatmul.mubr.msk.bf16.gmra.mxu1 %vm148_vm0, %v853_v10 }
  0x17   :  { %813 = vmatprep.mubr.msk.bf16.mxu0 %vm148_vm0, %v854_v11  ;;  %829 = vmatprep.mubr.msk.bf16.mxu1 %vm148_vm0, %v855_v12 }
  0x1e   :  { %814 = vmatmul.mubr.msk.bf16.gmra.mxu0 %vm148_vm0, %v856_v13  ;;  %830 = vmatmul.mubr.msk.bf16.gmra.mxu1 %vm148_vm0, %v857_v14 }
  0x1f   :  { %817 = vmatprep.mubr.msk.bf16.mxu0 %vm148_vm0, %v858_v15  ;;  %833 = vmatprep.mubr.msk.bf16.mxu1 %vm148_vm0, %v859_v16 }
  0x26   :  { %818 = vmatmul.mubr.msk.bf16.gmra.mxu0 %vm148_vm0, %v860_v17  ;;  %834 = vmatmul.mubr.msk.bf16.gmra.mxu1 %vm148_vm0, %v861_v18 }
  0xce   :  { %v807_v19 = vpop.f32.mrf.mxu0  ;;  %v823_v20 = vpop.f32.mrf.mxu1 }
  0xcf   :  { %v360_v21 = vmul.f32 0.2, %v807_v19  ;;  %v376_v22 = vmul.f32 0.2, %v823_v20 }
  0xd0   :  { %v231_v23 = vpop.f32.mrf.mxu0  ;;  %v295_v24 = vpop.f32.mrf.mxu1 }
  0xd1   :  { %v358_v25 = vmul.f32 0.2, %v231_v23  ;;  %v374_v26 = vmul.f32 0.2, %v295_v24  ;;  %v392_v31 = vmax.f32 %v807_v19, %v360_v21  ;;  %v408_v32 = vmax.f32 %v823_v20, %v376_v22 }
  0xd2   :  { %v808_v27 = vpop.f32.mrf.mxu0  ;;  %v824_v28 = vpop.f32.mrf.mxu1 }
  0xd3   :  { %v361_v29 = vmul.f32 0.2, %v808_v27  ;;  %v377_v30 = vmul.f32 0.2, %v824_v28  ;;  %v390_v39 = vmax.f32 %v231_v23, %v358_v25  ;;  %v406_v40 = vmax.f32 %v295_v24, %v374_v26 }
  0xd4   :  { %v234_v33 = vpop.f32.mrf.mxu0  ;;  %v298_v34 = vpop.f32.mrf.mxu1 }
  0xd5   :  { %v393_v35 = vmax.f32 %v808_v27, %v361_v29  ;;  %v409_v36 = vmax.f32 %v824_v28, %v377_v30  ;;  %v359_v37 = vmul.f32 0.2, %v234_v33  ;;  %v375_v38 = vmul.f32 0.2, %v298_v34 }
  0xd6   :  { %v811_v41 = vpop.f32.mrf.mxu0  ;;  %v827_v42 = vpop.f32.mrf.mxu1 }
  0xd7   :  { %v693_v43 = vpack.c.bf16 %v393_v35, %v392_v31  ;;  %v733_v44 = vpack.c.bf16 %v409_v36, %v408_v32  ;;  %v391_v45 = vmax.f32 %v234_v33, %v359_v37  ;;  %v407_v46 = vmax.f32 %v298_v34, %v375_v38 }
  0xd8   :  { %v364_v47 = vmul.f32 0.2, %v811_v41  ;;  %v380_v48 = vmul.f32 0.2, %v827_v42  ;;  %v247_v49 = vpop.f32.mrf.mxu0  ;;  %v311_v50 = vpop.f32.mrf.mxu1 }
  0xd9   :  { %765 = vst [vmem:[%s1000_s2 + $0x8] sm:$0xff] %v693_v43   ;;  %773 = vst [vmem:[%s1000_s2 + $0x48] sm:$0xff] %v733_v44   ;;  %v688_v51 = vpack.c.bf16 %v391_v45, %v390_v39  ;;  %v728_v52 = vpack.c.bf16 %v407_v46, %v406_v40  ;;  %v362_v53 = vmul.f32 0.2, %v247_v49  ;;  %v378_v54 = vmul.f32 0.2, %v311_v50 }
  0xda   :  { %v812_v55 = vpop.f32.mrf.mxu0  ;;  %v828_v56 = vpop.f32.mrf.mxu1  ;;  %v396_v59 = vmax.f32 %v811_v41, %v364_v47  ;;  %v412_v60 = vmax.f32 %v827_v42, %v380_v48 }
  0xdb   :  { %689 = vst [vmem:[%s1000_s2] sm:$0xff] %v688_v51   ;;  %772 = vst [vmem:[%s1000_s2 + $0x40] sm:$0xff] %v728_v52   ;;  %v365_v57 = vmul.f32 0.2, %v812_v55  ;;  %v381_v58 = vmul.f32 0.2, %v828_v56  ;;  %v394_v3 = vmax.f32 %v247_v49, %v362_v53  ;;  %v410_v4 = vmax.f32 %v311_v50, %v378_v54 }
  0xdc   :  { %v250_v61 = vpop.f32.mrf.mxu0  ;;  %v314_v62 = vpop.f32.mrf.mxu1 }
  0xdd   :  { %v397_v63 = vmax.f32 %v812_v55, %v365_v57  ;;  %v413_v0 = vmax.f32 %v828_v56, %v381_v58  ;;  %v363_v1 = vmul.f32 0.2, %v250_v61  ;;  %v379_v2 = vmul.f32 0.2, %v314_v62 }
  0xde   :  { %v815_v5 = vpop.f32.mrf.mxu0  ;;  %v831_v6 = vpop.f32.mrf.mxu1 }
  0xdf   :  { %v703_v7 = vpack.c.bf16 %v397_v63, %v396_v59  ;;  %v743_v8 = vpack.c.bf16 %v413_v0, %v412_v60  ;;  %v395_v9 = vmax.f32 %v250_v61, %v363_v1  ;;  %v411_v10 = vmax.f32 %v314_v62, %v379_v2 }
  0xe0   :  { %v368_v11 = vmul.f32 0.2, %v815_v5  ;;  %v384_v12 = vmul.f32 0.2, %v831_v6  ;;  %v263_v13 = vpop.f32.mrf.mxu0  ;;  %v327_v14 = vpop.f32.mrf.mxu1 }
  0xe1   :  { %767 = vst [vmem:[%s1000_s2 + $0x18] sm:$0xff] %v703_v7   ;;  %775 = vst [vmem:[%s1000_s2 + $0x58] sm:$0xff] %v743_v8   ;;  %v698_v15 = vpack.c.bf16 %v395_v9, %v394_v3  ;;  %v738_v16 = vpack.c.bf16 %v411_v10, %v410_v4  ;;  %v366_v17 = vmul.f32 0.2, %v263_v13  ;;  %v382_v18 = vmul.f32 0.2, %v327_v14 }
  0xe2   :  { %v816_v19 = vpop.f32.mrf.mxu0  ;;  %v832_v20 = vpop.f32.mrf.mxu1  ;;  %v400_v23 = vmax.f32 %v815_v5, %v368_v11  ;;  %v416_v24 = vmax.f32 %v831_v6, %v384_v12 }
  0xe3   :  { %766 = vst [vmem:[%s1000_s2 + $0x10] sm:$0xff] %v698_v15   ;;  %774 = vst [vmem:[%s1000_s2 + $0x50] sm:$0xff] %v738_v16   ;;  %v369_v21 = vmul.f32 0.2, %v816_v19  ;;  %v385_v22 = vmul.f32 0.2, %v832_v20  ;;  %v398_v31 = vmax.f32 %v263_v13, %v366_v17  ;;  %v414_v32 = vmax.f32 %v327_v14, %v382_v18 }
  0xe4   :  { %v266_v25 = vpop.f32.mrf.mxu0  ;;  %v330_v26 = vpop.f32.mrf.mxu1 }
  0xe5   :  { %v401_v27 = vmax.f32 %v816_v19, %v369_v21  ;;  %v417_v28 = vmax.f32 %v832_v20, %v385_v22  ;;  %v367_v29 = vmul.f32 0.2, %v266_v25  ;;  %v383_v30 = vmul.f32 0.2, %v330_v26 }
  0xe6   :  { %v819_v33 = vpop.f32.mrf.mxu0  ;;  %v835_v34 = vpop.f32.mrf.mxu1 }
  0xe7   :  { %v713_v35 = vpack.c.bf16 %v401_v27, %v400_v23  ;;  %v753_v36 = vpack.c.bf16 %v417_v28, %v416_v24  ;;  %v399_v37 = vmax.f32 %v266_v25, %v367_v29  ;;  %v415_v38 = vmax.f32 %v330_v26, %v383_v30 }
  0xe8   :  { %v372_v39 = vmul.f32 0.2, %v819_v33  ;;  %v388_v40 = vmul.f32 0.2, %v835_v34  ;;  %v279_v41 = vpop.f32.mrf.mxu0  ;;  %v343_v42 = vpop.f32.mrf.mxu1 }
  0xe9   :  { %769 = vst [vmem:[%s1000_s2 + $0x28] sm:$0xff] %v713_v35   ;;  %777 = vst [vmem:[%s1000_s2 + $0x68] sm:$0xff] %v753_v36   ;;  %v708_v43 = vpack.c.bf16 %v399_v37, %v398_v31  ;;  %v748_v44 = vpack.c.bf16 %v415_v38, %v414_v32  ;;  %v370_v45 = vmul.f32 0.2, %v279_v41  ;;  %v386_v46 = vmul.f32 0.2, %v343_v42 }
  0xea   :  { %v820_v47 = vpop.f32.mrf.mxu0  ;;  %v836_v48 = vpop.f32.mrf.mxu1  ;;  %v404_v51 = vmax.f32 %v819_v33, %v372_v39  ;;  %v420_v52 = vmax.f32 %v835_v34, %v388_v40 }
  0xeb   :  { %768 = vst [vmem:[%s1000_s2 + $0x20] sm:$0xff] %v708_v43   ;;  %776 = vst [vmem:[%s1000_s2 + $0x60] sm:$0xff] %v748_v44   ;;  %v373_v49 = vmul.f32 0.2, %v820_v47  ;;  %v389_v50 = vmul.f32 0.2, %v836_v48  ;;  %v402_v59 = vmax.f32 %v279_v41, %v370_v45  ;;  %v418_v60 = vmax.f32 %v343_v42, %v386_v46 }
  0xec   :  { %v282_v53 = vpop.f32.mrf.mxu0  ;;  %v346_v54 = vpop.f32.mrf.mxu1 }
  0xed   :  { %v405_v55 = vmax.f32 %v820_v47, %v373_v49  ;;  %v421_v56 = vmax.f32 %v836_v48, %v389_v50  ;;  %v371_v57 = vmul.f32 0.2, %v282_v53  ;;  %v387_v58 = vmul.f32 0.2, %v346_v54 }
  0xef   :  { %v723_v61 = vpack.c.bf16 %v405_v55, %v404_v51  ;;  %v763_v62 = vpack.c.bf16 %v421_v56, %v420_v52  ;;  %v403_v63 = vmax.f32 %v282_v53, %v371_v57  ;;  %v419_v0 = vmax.f32 %v346_v54, %v387_v58 }
  0xf1   :  { %771 = vst [vmem:[%s1000_s2 + $0x38] sm:$0xff] %v723_v61   ;;  %779 = vst [vmem:[%s1000_s2 + $0x78] sm:$0xff] %v763_v62   ;;  %v718_v1 = vpack.c.bf16 %v403_v63, %v402_v59  ;;  %v758_v2 = vpack.c.bf16 %v419_v0, %v418_v60 }
  0xf3   :  { %770 = vst [vmem:[%s1000_s2 + $0x30] sm:$0xff] %v718_v1   ;;  %778 = vst [vmem:[%s1000_s2 + $0x70] sm:$0xff] %v758_v2  }

// kernel: discriminator_forward.4
= control target key start
LH: loop header
LB: loop body
LE: loop exit
PB: predicated region body
PF: predicated region fallthrough
CT: control target
= control target key end

     0   :  { %v193_v32 = vlaneseq  ;;  %s568_s1 = inlined_call_operand.vmem [shape: bf16[128,128], index: 1, kind: input, shape index: {}]   ;;  %s569_s0 = inlined_call_operand.vmem [shape: bf16[64,128], index: 0, kind: input, shape index: {}]   ;;  %s570_s2 = inlined_call_operand.vmem [shape: f32[1,128], index: 2, kind: input, shape index: {}]   ;;  %s571_s3 = inlined_call_operand.vmem [shape: f32[1,128], index: 3, kind: input, shape index: {}]   ;;  %s572_s4 = inlined_call_operand.vmem [shape: bf16[64,128], index: 4, kind: output, shape index: {}]  }
   0x1   :  { %v446_v0 = vld [vmem:[%s568_s1 + $0x38] sm:$0xff]   ;;  %v447_v1 = vld [vmem:[%s568_s1 + $0x30] sm:$0xff]   ;;  %v448_v2 = vld [vmem:[%s568_s1 + $0x28] sm:$0xff]  }
   0x2   :  { %406 = vmatprep.subr.bf16.mxu0 %v446_v0  ;;  %430 = vmatprep.subr.bf16.mxu1 %v446_v0  ;;  %v449_v3 = vld [vmem:[%s568_s1 + $0x20] sm:$0xff]   ;;  %v456_v5 = vld [vmem:[%s569_s0 + $0x10] sm:$0xff]   ;;  %v450_v6 = vld [vmem:[%s568_s1 + $0x18] sm:$0xff]   ;;  %v194_v35 = vshrl.u32 %v193_v32, 7 }
   0x3   :  { %407 = vmatpush3.bf16.msra.mxu0 %v446_v0  ;;  %438 = vmatpush3.bf16.msra.mxu1 %v446_v0  ;;  %v454_v4 = vld [vmem:[%s569_s0] sm:$0xff]   ;;  %v451_v7 = vld [vmem:[%s568_s1 + $0x10] sm:$0xff]   ;;  %v452_v8 = vld [vmem:[%s568_s1 + $0x8] sm:$0xff]  }
   0x4   :  { %408 = vmatprep.subr.bf16.mxu0 %v447_v1  ;;  %431 = vmatprep.subr.bf16.mxu1 %v447_v1  ;;  %v453_v9 = vld [vmem:[%s568_s1] sm:$0xff]   ;;  %v455_v10 = vld [vmem:[%s569_s0 + $0x8] sm:$0xff]   ;;  %v457_v11 = vld [vmem:[%s569_s0 + $0x18] sm:$0xff]   ;;  %v200_v39 = vadd.s32 48, %v194_v35 }
   0x5   :  { %422 = vmatprep.mubr.bf16.mxu0 %v454_v4  ;;  %426 = vmatprep.mubr.bf16.mxu1 %v456_v5 }
   0x6   :  { %vm208_vm0 = vcmp.lt.s32.totalorder %v200_v39, 50 }
   0x7   :  { %409 = vmatpush3.bf16.msra.mxu0 %v447_v1  ;;  %439 = vmatpush3.bf16.msra.mxu1 %v447_v1 }
   0x8   :  { %410 = vmatprep.subr.bf16.mxu0 %v448_v2  ;;  %432 = vmatprep.subr.bf16.mxu1 %v448_v2 }
   0xb   :  { %411 = vmatpush3.bf16.msra.mxu0 %v448_v2  ;;  %440 = vmatpush3.bf16.msra.mxu1 %v448_v2  ;;  %v248_v2 = vld [vmem:[%s570_s2] sm:$0x1] }
   0xc   :  { %412 = vmatprep.subr.bf16.mxu0 %v449_v3  ;;  %433 = vmatprep.subr.bf16.mxu1 %v449_v3 }
   0xf   :  { %413 = vmatpush3.bf16.msra.mxu0 %v449_v3  ;;  %441 = vmatpush3.bf16.msra.mxu1 %v449_v3  ;;  %v258_v3 = vsub.s32 0, %v194_v35 }
  0x10   :  { %414 = vmatprep.subr.bf16.mxu0 %v450_v6  ;;  %434 = vmatprep.subr.bf16.mxu1 %v450_v6 }
  0x13   :  { %415 = vmatpush3.bf16.msra.mxu0 %v450_v6  ;;  %442 = vmatpush3.bf16.msra.mxu1 %v450_v6  ;;  %v252_v6 = vld [vmem:[%s571_s3] sm:$0x1] }
  0x14   :  { %416 = vmatprep.subr.bf16.mxu0 %v451_v7  ;;  %435 = vmatprep.subr.bf16.mxu1 %v451_v7 }
  0x17   :  { %417 = vmatpush3.bf16.msra.mxu0 %v451_v7  ;;  %443 = vmatpush3.bf16.msra.mxu1 %v451_v7 }
  0x18   :  { %418 = vmatprep.subr.bf16.mxu0 %v452_v8  ;;  %436 = vmatprep.subr.bf16.mxu1 %v452_v8 }
  0x1b   :  { %419 = vmatpush3.bf16.msra.mxu0 %v452_v8  ;;  %444 = vmatpush3.bf16.msra.mxu1 %v452_v8 }
  0x1c   :  { %420 = vmatprep.subr.bf16.mxu0 %v453_v9  ;;  %437 = vmatprep.subr.bf16.mxu1 %v453_v9 }
  0x1f   :  { %421 = vmatpush3.bf16.msra.mxu0 %v453_v9  ;;  %445 = vmatpush3.bf16.msra.mxu1 %v453_v9 }
  0x22   :  { %423 = vmatmul.mubr.bf16.vlgmr.msra.gmra.mxu0 %v455_v10  ;;  %427 = vmatmul.mubr.bf16.vlgmr.msra.gmra.mxu1 %v457_v11 }
  0xe2   :  { %v521_v12 = vpop.f32.mrf.mxu0  ;;  %v525_v14 = vpop.f32.mrf.mxu1 }
  0xe4   :  { %v523_v13 = vpop.f32.mrf.mxu0  ;;  %v529_v16 = vpop.f32.mrf.mxu1 }
  0xe6   :  { %v527_v15 = vpop.f32.mrf.mxu0  ;;  %v533_v20 = vpop.f32.mrf.mxu1 }
  0xe8   :  { %v151_v17 = vpop.f32.mrf.mxu0  ;;  %v167_v23 = vpop.f32.mrf.mxu1 }
  0xe9   :  { %v179_v18 = vadd.f32 %v151_v17, %v523_v13 }
  0xeb   :  { %v180_v19 = vadd.f32 %v521_v12, %v179_v18 }
  0xed   :  { %v181_v21 = vadd.f32 %v527_v15, %v180_v19 }
  0xef   :  { %v182_v22 = vadd.f32 %v181_v21, %v529_v16 }
  0xf1   :  { %v183_v24 = vadd.f32 %v182_v22, %v167_v23 }
  0xf3   :  { %v184_v25 = vadd.f32 %v525_v14, %v183_v24 }
  0xf5   :  { %v185_v26 = vadd.f32 %v533_v20, %v184_v25 }
  0xf7   :  { %v186_v27 = vrot.slane %v185_v26, 4 }
  0xf9   :  { %v187_v28 = vadd.f32 %v186_v27, %v185_v26 }
  0xfb   :  { %v188_v29 = vrot.slane %v187_v28, 2 }
  0xfd   :  { %v189_v30 = vadd.f32 %v188_v29, %v187_v28 }
  0xff   :  { %v190_v31 = vrot.slane %v189_v30, 1 }
 0x101   :  { %v191_v33 = vadd.f32 %v190_v31, %v189_v30 }
 0x103   :  { %v192_v34 = vmul.f32 0.02, %v191_v33 }
 0x105   :  { %v210_v36 = vsub.f32 %v523_v13, %v192_v34  ;;  %v211_v37 = vsub.f32 %v151_v17, %v192_v34  ;;  %v212_v38 = vsub.f32 %v521_v12, %v192_v34  ;;  %v213_v40 = vsub.f32 %v527_v15, %v192_v34 }
 0x106   :  { %v214_v43 = vsub.f32 %v529_v16, %v192_v34  ;;  %v216_v46 = vsub.f32 %v525_v14, %v192_v34  ;;  %v215_v47 = vsub.f32 %v167_v23, %v192_v34 }
 0x107   :  { %v226_v41 = vmul.f32 %v210_v36, %v210_v36  ;;  %v227_v42 = vmul.f32 %v211_v37, %v211_v37  ;;  %v228_v44 = vmul.f32 %v212_v38, %v212_v38  ;;  %v229_v48 = vmul.f32 %v213_v40, %v213_v40 }
 0x108   :  { %v230_v50 = vmul.f32 %v214_v43, %v214_v43  ;;  %v224_v52 = vsel %vm208_vm0, %v216_v46, 0.0  ;;  %v231_v53 = vmul.f32 %v215_v47, %v215_v47 }
 0x109   :  { %v234_v45 = vadd.f32 %v227_v42, %v226_v41  ;;  %v232_v55 = vmul.f32 %v224_v52, %v224_v52 }
 0x10b   :  { %v235_v49 = vadd.f32 %v234_v45, %v228_v44 }
 0x10d   :  { %v236_v51 = vadd.f32 %v235_v49, %v229_v48 }
 0x10f   :  { %v237_v54 = vadd.f32 %v236_v51, %v230_v50 }
 0x111   :  { %v238_v56 = vadd.f32 %v237_v54, %v231_v53 }
 0x113   :  { %v239_v57 = vadd.f32 %v238_v56, %v232_v55 }
 0x115   :  { %v241_v58 = vrot.slane %v239_v57, 4 }
 0x117   :  { %v242_v59 = vadd.f32 %v241_v58, %v239_v57 }
 0x119   :  { %v243_v60 = vrot.slane %v242_v59, 2 }
 0x11b   :  { %v244_v61 = vadd.f32 %v243_v60, %v242_v59 }
 0x11d   :  { %v245_v62 = vrot.slane %v244_v61, 1 }
 0x11f   :  { %v246_v63 = vadd.f32 %v245_v62, %v244_v61 }
 0x121   :  { %v247_v0 = vmul.f32 0.02, %v246_v63 }
 0x123   :  { %v249_v1 = vadd.f32 1e-05, %v247_v0 }
 0x125   :  { %458 = vrsqrt.f32 %v249_v1 }
 0x132   :  { %v459_v4 = vpop.eup %458 }
 0x133   :  { %v251_v5 = vmul.f32 %v459_v4, %v248_v2 }
 0x135   :  { %v253_v7 = vmul.f32 %v251_v5, %v192_v34  ;;  %v259_v8 = vrot.slane %v251_v5, %v258_v3 }
 0x137   :  { %v254_v9 = vsub.f32 %v252_v6, %v253_v7  ;;  %v261_v10 = vmul.f32 %v259_v8, %v523_v13  ;;  %v262_v11 = vmul.f32 %v259_v8, %v151_v17  ;;  %v263_v18 = vmul.f32 %v521_v12, %v259_v8 }
 0x138   :  { %v264_v19 = vmul.f32 %v527_v15, %v259_v8  ;;  %v265_v22 = vmul.f32 %v259_v8, %v529_v16  ;;  %v266_v24 = vmul.f32 %v259_v8, %v167_v23  ;;  %v267_v25 = vmul.f32 %v525_v14, %v259_v8 }
 0x139   :  { %v273_v21 = vrot.slane %v254_v9, %v258_v3  ;;  %v268_v26 = vmul.f32 %v533_v20, %v259_v8 }
 0x13b   :  { %v275_v27 = vadd.f32 %v273_v21, %v261_v10  ;;  %v276_v28 = vadd.f32 %v273_v21, %v262_v11  ;;  %v277_v29 = vadd.f32 %v273_v21, %v263_v18  ;;  %v278_v30 = vadd.f32 %v273_v21, %v264_v19 }
 0x13c   :  { %v279_v31 = vadd.f32 %v273_v21, %v265_v22  ;;  %v280_v32 = vadd.f32 %v273_v21, %v266_v24  ;;  %v281_v13 = vadd.f32 %v273_v21, %v267_v25  ;;  %v282_v17 = vadd.f32 %v273_v21, %v268_v26 }
 0x13d   :  { %v283_v33 = vmul.f32 0.2, %v275_v27  ;;  %v284_v12 = vmul.f32 0.2, %v276_v28  ;;  %v285_v34 = vmul.f32 0.2, %v277_v29 }
 0x13e   :  { %v286_v15 = vmul.f32 0.2, %v278_v30  ;;  %v287_v35 = vmul.f32 0.2, %v279_v31  ;;  %v288_v36 = vmul.f32 0.2, %v280_v32 }
 0x13f   :  { %v289_v16 = vmul.f32 0.2, %v281_v13  ;;  %v290_v23 = vmul.f32 0.2, %v282_v17  ;;  %v291_v37 = vmax.f32 %v275_v27, %v283_v33  ;;  %v292_v14 = vmax.f32 %v276_v28, %v284_v12 }
 0x140   :  { %v293_v38 = vmax.f32 %v277_v29, %v285_v34  ;;  %v294_v20 = vmax.f32 %v278_v30, %v286_v15  ;;  %v295_v39 = vmax.f32 %v279_v31, %v287_v35  ;;  %v296_v40 = vmax.f32 %v280_v32, %v288_v36 }
 0x141   :  { %v297_v41 = vmax.f32 %v281_v13, %v289_v16  ;;  %v298_v42 = vmax.f32 %v282_v17, %v290_v23  ;;  %v374_v43 = vpack.c.bf16 %v292_v14, %v291_v37 }
 0x142   :  { %v379_v44 = vpack.c.bf16 %v294_v20, %v293_v38  ;;  %v384_v45 = vpack.c.bf16 %v296_v40, %v295_v39 }
 0x143   :  { %375 = vst [vmem:[%s572_s4] sm:$0xff] %v374_v43   ;;  %v389_v46 = vpack.c.bf16 %v298_v42, %v297_v41 }
 0x144   :  { %391 = vst [vmem:[%s572_s4 + $0x8] sm:$0xff] %v379_v44   ;;  %392 = vst [vmem:[%s572_s4 + $0x10] sm:$0xff] %v384_v45  }
 0x145   :  { %393 = vst [vmem:[%s572_s4 + $0x18] sm:$0xff] %v389_v46  }

// kernel: discriminator_forward.5
= control target key start
LH: loop header
LB: loop body
LE: loop exit
PB: predicated region body
PF: predicated region fallthrough
CT: control target
= control target key end

     0   :  { %s353_s1 = inlined_call_operand.vmem [shape: bf16[256,128], index: 1, kind: input, shape index: {}]   ;;  %s354_s0 = inlined_call_operand.vmem [shape: bf16[16,256], index: 0, kind: input, shape index: {}]   ;;  %s355_s2 = inlined_call_operand.vmem [shape: f32[16,128], index: 2, kind: output, shape index: {}]  }
   0x1   :  { %v251_v0 = vld [vmem:[%s353_s1 + $0x78] sm:$0xff]   ;;  %v253_v2 = vld [vmem:[%s353_s1 + $0x70] sm:$0xff]   ;;  %v255_v4 = vld [vmem:[%s353_s1 + $0x68] sm:$0xff]  }
   0x2   :  { %v252_v1 = vld [vmem:[%s353_s1 + $0x38] sm:$0xff]   ;;  %229 = vmatprep.subr.bf16.mxu0 %v251_v0  ;;  %v254_v3 = vld [vmem:[%s353_s1 + $0x30] sm:$0xff]   ;;  %v256_v5 = vld [vmem:[%s353_s1 + $0x28] sm:$0xff]  }
   0x3   :  { %230 = vmatpush3.bf16.msra.mxu0 %v252_v1  ;;  %v257_v6 = vld [vmem:[%s353_s1 + $0x60] sm:$0xff]   ;;  %v259_v8 = vld [vmem:[%s353_s1 + $0x58] sm:$0xff]   ;;  %v261_v10 = vld [vmem:[%s353_s1 + $0x50] sm:$0xff]  }
   0x4   :  { %231 = vmatprep.subr.bf16.mxu0 %v253_v2  ;;  %v258_v7 = vld [vmem:[%s353_s1 + $0x20] sm:$0xff]   ;;  %v260_v9 = vld [vmem:[%s353_s1 + $0x18] sm:$0xff]   ;;  %v262_v12 = vld [vmem:[%s353_s1 + $0x10] sm:$0xff]  }
   0x5   :  { %v269_v11 = vld [vmem:[%s354_s0 + $0x4] ss:$8 sps:$4 sm:$0xff]   ;;  %v267_v17 = vld [vmem:[%s354_s0] ss:$8 sps:$4 sm:$0xff]  }
   0x6   :  { %184 = vmatprep.mubr.bf16.mxu0 %v269_v11  ;;  %v263_v13 = vld [vmem:[%s353_s1 + $0x48] sm:$0xff]   ;;  %v265_v15 = vld [vmem:[%s353_s1 + $0x40] sm:$0xff]  }
   0x7   :  { %232 = vmatpush3.bf16.msra.mxu0 %v254_v3  ;;  %v264_v14 = vld [vmem:[%s353_s1 + $0x8] sm:$0xff]   ;;  %v266_v16 = vld [vmem:[%s353_s1] sm:$0xff]  }
   0x8   :  { %233 = vmatprep.subr.bf16.mxu0 %v255_v4 }
   0xb   :  { %234 = vmatpush3.bf16.msra.mxu0 %v256_v5 }
   0xc   :  { %235 = vmatprep.subr.bf16.mxu0 %v257_v6 }
   0xf   :  { %236 = vmatpush3.bf16.msra.mxu0 %v258_v7 }
  0x10   :  { %237 = vmatprep.subr.bf16.mxu0 %v259_v8 }
  0x13   :  { %238 = vmatpush3.bf16.msra.mxu0 %v260_v9 }
  0x14   :  { %239 = vmatprep.subr.bf16.mxu0 %v261_v10 }
  0x17   :  { %240 = vmatpush3.bf16.msra.mxu0 %v262_v12 }
  0x18   :  { %241 = vmatprep.subr.bf16.mxu0 %v263_v13 }
  0x1b   :  { %242 = vmatpush3.bf16.msra.mxu0 %v264_v14 }
  0x1c   :  { %243 = vmatprep.subr.bf16.mxu0 %v265_v15 }
  0x1f   :  { %244 = vmatpush3.bf16.msra.mxu0 %v266_v16 }
  0x22   :  { %185 = vmatmul.mubr.bf16.vlgmr.msra.gmra.mxu0 %v267_v17 }
  0xe2   :  { %v245_v18 = vpop.f32.mrf.mxu0 }
  0xe4   :  { %v246_v19 = vpop.f32.mrf.mxu0 }
  0xe5   :  { %v247_v20 = vadd.f32 %v246_v19, %v245_v18 }
  0xe6   :  { %v248_v21 = vpop.f32.mrf.mxu0 }
  0xe7   :  { %v193_v22 = vsub.f32 0.0, %v247_v20 }
  0xe8   :  { %v249_v23 = vpop.f32.mrf.mxu0 }
  0xe9   :  { %v195_v24 = vmul.f32 1.442695, %v193_v22  ;;  %v250_v25 = vadd.f32 %v249_v23, %v248_v21 }
  0xeb   :  { %270 = vpow2.f32 %v195_v24  ;;  %v194_v26 = vsub.f32 0.0, %v250_v25 }
  0xed   :  { %v197_v27 = vmul.f32 1.442695, %v194_v26 }
  0xef   :  { %272 = vpow2.f32 %v197_v27 }
  0xf8   :  { %v271_v28 = vpop.eup %270 }
  0xf9   :  { %v199_v29 = vadd.f32 1.0, %v271_v28 }
  0xfb   :  { %274 = vrcp.f32 %v199_v29 }
  0xfc   :  { %v273_v30 = vpop.eup %272 }
  0xfd   :  { %v200_v31 = vadd.f32 1.0, %v273_v30 }
  0xff   :  { %276 = vrcp.f32 %v200_v31 }
 0x108   :  { %v275_v32 = vpop.eup %274 }
 0x109   :  { %205 = vst [vmem:[%s355_s2] sm:$0xff] %v275_v32 }
 0x10c   :  { %v277_v33 = vpop.eup %276 }
 0x10d   :  { %206 = vst [vmem:[%s355_s2 + $0x8] sm:$0xff] %v277_v33 }

</bundles_post_ra>
